<compile_context>
chip_gen: v7x
topology: tpu7x:2x2x1
jax: 0.10.0
libtpu: 0.0.40
codegen_flags: <defaults>
</compile_context>

<pallas_src>
import functools

import jax
import jax.numpy as jnp
from jax.experimental import pallas as pl
from jax.experimental.pallas import tpu as pltpu

EPS = 1e-6          # nn.LayerNorm(embed_size, 1e-06) in the spec
LANE = 128          # TPU lane width


# -------------------------- hardware-aware knobs ------------------------------
@functools.lru_cache(maxsize=None)
def _vmem_limit_bytes():
    """128-MiB chips (v5e/v6e) -> 100 MiB; 64-MiB chips (v7x) -> 48 MiB."""
    try:
        cap = int(pltpu.get_tpu_info().vmem_capacity_bytes)
    except Exception:
        cap = 64 * 1024 * 1024                   # conservative, safe everywhere
    return int(min(cap - 16 * 1024 * 1024, 100 * 1024 * 1024))


@functools.lru_cache(maxsize=None)
def _buffered_one_supported():
    """Probe whether BlockSpec(pipeline_mode=pl.Buffered(1)) works on this JAX,
    so grid-invariant weights can be single-buffered (2x VMEM saving)."""
    try:
        def k(a_ref, o_ref):
            o_ref[...] = a_ref[...]

        f = pl.pallas_call(
            k,
            out_shape=jax.ShapeDtypeStruct((8, LANE), jnp.float32),
            grid=(2,),
            in_specs=[pl.BlockSpec((8, LANE), lambda i: (0, 0),
                                   pipeline_mode=pl.Buffered(1))],
            out_specs=pl.BlockSpec((8, LANE), lambda i: (0, 0)),
        )
        jax.block_until_ready(f(jnp.zeros((8, LANE), jnp.float32)))
        return True
    except Exception:
        return False


def _cparams(sem):
    return pltpu.CompilerParams(dimension_semantics=sem,
                                vmem_limit_bytes=_vmem_limit_bytes())


def _invariant_spec(shape):
    """Whole-array block whose index never changes across the grid; single-
    buffered when supported (no overlap to buy, halves its VMEM footprint)."""
    idx = lambda *_: (0,) * len(shape)
    if _buffered_one_supported():
        return pl.BlockSpec(shape, idx, pipeline_mode=pl.Buffered(1))
    return pl.BlockSpec(shape, idx)


# ----------------------------- elementwise helpers ---------------------------
def _bf16(x):
    return x.astype(jnp.bfloat16)


def _layernorm(v, w, b):
    mu = jnp.mean(v, axis=-1, keepdims=True)
    var = jnp.mean((v - mu) ** 2, axis=-1, keepdims=True)
    return (v - mu) * jax.lax.rsqrt(var + EPS) * w + b


def _gelu(x):
    # TODO(synk): nn.GELU() default is the exact erf-based GELU; the tanh
    # approximation is used (max abs dev ~3e-3) since erf lowering is not
    # guaranteed in Mosaic.
    c = jnp.float32(0.7978845608028654)  # sqrt(2/pi)
    return 0.5 * x * (1.0 + jnp.tanh(c * (x + 0.044715 * x * x * x)))


# ----------------- patch embedding: Conv2d(k=P, stride=P) == matmul ----------
def patch_embed_kernel(a_ref, w_ref, b_ref, o_ref):
    # a_ref / w_ref are bf16 (cast in the wrapper), accumulate f32, store bf16.
    o_ref[...] = (
        jnp.dot(a_ref[...], w_ref[...], preferred_element_type=jnp.float32)
        + b_ref[...]
    ).astype(o_ref.dtype)


# ----------------- fused encoder block: attention + MLP ----------------------
def block_kernel(x_ref, ln1w_ref, ln1b_ref, qkvw_ref, qkvb_ref,
                 projw_ref, projb_ref, ln2w_ref, ln2b_ref,
                 fc1w_ref, fc1b_ref, fc2w_ref, fc2b_ref, o_ref, *, heads):
    x = x_ref[0].astype(jnp.float32)                     # (S, E) f32 working copy
    S, E = x.shape
    hd = E // heads
    scale = 1.0 / (hd ** 0.5)

    # ---------------- attention half (pre-LN) ----------------
    xn = _layernorm(x, ln1w_ref[...], ln1b_ref[...])
    qkv = jnp.dot(_bf16(xn), qkvw_ref[...],
                  preferred_element_type=jnp.float32) + qkvb_ref[...]   # (S, 3E)

    # Batched-head layout (heads, S, hd); 1/sqrt(hd) folded into q.
    q = (qkv[:, 0 * E:1 * E] * scale).reshape(S, heads, hd).transpose(1, 0, 2)
    k = qkv[:, 1 * E:2 * E].reshape(S, heads, hd).transpose(1, 0, 2)
    v = qkv[:, 2 * E:3 * E].reshape(S, heads, hd).transpose(1, 0, 2)

    att = jnp.einsum("hqd,hkd->hqk", _bf16(q), _bf16(k),
                     preferred_element_type=jnp.float32)                # (h, S, S)
    att = att - jnp.max(att, axis=-1, keepdims=True)
    p = jnp.exp(att)
    p = p * pl.reciprocal(jnp.sum(p, axis=-1, keepdims=True), approx=True)
    ctx = jnp.einsum("hqk,hkd->hqd", _bf16(p), _bf16(v),
                     preferred_element_type=jnp.float32)                # (h, S, hd)

    # Head-concat folded into the output projection: proj_w stored as
    # (heads, hd, E), so no (h,S,hd)->(S,E) transpose/relayout is required.
    proj = jnp.sum(
        jnp.einsum("hqd,hde->hqe", _bf16(ctx), projw_ref[...],
                   preferred_element_type=jnp.float32),
        axis=0) + projb_ref[...]
    h1 = x + proj                                        # residual 1 (f32)

    # ---------------- MLP half (pre-LN, single shot, LN computed once) -------
    # TODO(synk): tile the hidden dim with an inner pipeline for very large
    # S*hidden on v7x; at ViT-B sizes the bf16 weights fit VMEM untiled.
    hn = _layernorm(h1, ln2w_ref[...], ln2b_ref[...])
    h = jnp.dot(_bf16(hn), fc1w_ref[...],
                preferred_element_type=jnp.float32) + fc1b_ref[...]
    h = _gelu(h)
    mlp = jnp.dot(_bf16(h), fc2w_ref[...],
                  preferred_element_type=jnp.float32) + fc2b_ref[...]

    o_ref[0] = (h1 + mlp).astype(o_ref.dtype)            # residual 2, store bf16


# ----------------- final LayerNorm + classifier on the cls token --------------
def head_kernel(x_ref, lnw_ref, lnb_ref, w_ref, b_ref, o_ref):
    xn = _layernorm(x_ref[...].astype(jnp.float32), lnw_ref[...], lnb_ref[...])
    o_ref[...] = (
        jnp.dot(_bf16(xn), w_ref[...], preferred_element_type=jnp.float32)
        + b_ref[...]
    ).astype(o_ref.dtype)


# ----------------- wrappers ---------------------------------------------------
def run_patch_embed(cols_bf16, w, b):
    M, K = cols_bf16.shape
    E = w.shape[1]
    tm = M if M <= 1024 else 1024            # large row tiles: near-roofline DMA,
    return pl.pallas_call(                   # half the per-step overhead vs 512
        patch_embed_kernel,
        out_shape=jax.ShapeDtypeStruct((M, E), jnp.bfloat16),
        grid=(pl.cdiv(M, tm),),
        in_specs=[pl.BlockSpec((tm, K), lambda i: (i, 0)),
                  _invariant_spec((K, E)), _invariant_spec((1, E))],
        out_specs=pl.BlockSpec((tm, E), lambda i: (i, 0)),
        compiler_params=_cparams(("parallel",)),
    )(cols_bf16, w, b)


def run_block(z, bp, heads):
    B, S, E = z.shape
    Hdim = bp["fc1_w"].shape[1]
    hd = E // heads
    kern = functools.partial(block_kernel, heads=heads)
    # TODO(synk): for v6e/v7x with larger batches, process bt>=2 batch elements
    # per grid step (flattened to (bt*S, E)) to better fill the 256x256 MXU.
    return pl.pallas_call(
        kern,
        out_shape=jax.ShapeDtypeStruct((B, S, E), z.dtype),
        grid=(B,),
        in_specs=[
            pl.BlockSpec((1, S, E), lambda b: (b, 0, 0)),
            _invariant_spec((1, E)), _invariant_spec((1, E)),            # ln1
            _invariant_spec((E, 3 * E)), _invariant_spec((1, 3 * E)),    # qkv
            _invariant_spec((heads, hd, E)), _invariant_spec((1, E)),    # proj
            _invariant_spec((1, E)), _invariant_spec((1, E)),            # ln2
            _invariant_spec((E, Hdim)), _invariant_spec((1, Hdim)),      # fc1
            _invariant_spec((Hdim, E)), _invariant_spec((1, E)),         # fc2
        ],
        out_specs=pl.BlockSpec((1, S, E), lambda b: (b, 0, 0)),
        compiler_params=_cparams(("parallel",)),
    )(z, bp["ln1_w"], bp["ln1_b"], bp["qkv_w"], bp["qkv_b"],
      bp["proj_w"], bp["proj_b"], bp["ln2_w"], bp["ln2_b"],
      bp["fc1_w"], bp["fc1_b"], bp["fc2_w"], bp["fc2_b"])


def run_head(x_cls, lnw, lnb, w_pad, b_pad, n_cls):
    B, E = x_cls.shape
    Np = w_pad.shape[1]                       # lane-dense padded classifier width
    out = pl.pallas_call(
        head_kernel,
        out_shape=jax.ShapeDtypeStruct((B, Np), jnp.float32),
        grid=(1,),
        in_specs=[pl.BlockSpec((B, E), lambda i: (0, 0)),
                  _invariant_spec((1, E)), _invariant_spec((1, E)),
                  _invariant_spec((E, Np)), _invariant_spec((1, Np))],
        out_specs=pl.BlockSpec((B, Np), lambda i: (0, 0)),
        compiler_params=_cparams(("arbitrary",)),
    )(x_cls, lnw, lnb, w_pad, b_pad)
    return out[:, :n_cls]


def vit_forward(x, params, *, heads, patch):
    B, C, H, W = x.shape
    P = patch
    Hp, Wp = H // P, W // P
    E = params["conv_w"].shape[1]

    # im2col matching Conv2d(k=P, stride=P) weight ordering (c, i, j); cast to
    # bf16 in the wrapper — the patch embed matmul is bandwidth-bound and is
    # computed in bf16 anyway, so this halves the dominant HBM read.
    cols = (x.reshape(B, C, Hp, P, Wp, P)
             .transpose(0, 2, 4, 1, 3, 5)
             .reshape(B * Hp * Wp, C * P * P)).astype(jnp.bfloat16)
    emb = run_patch_embed(cols, params["conv_w"], params["conv_b"])
    emb = emb.astype(jnp.float32).reshape(B, Hp * Wp, E)

    cls = jnp.broadcast_to(params["cls_token"], (B, 1, E))
    z = jnp.concatenate([cls, emb], axis=1) + params["pos_embed"]
    # pos_drop (p=0.5): identity in eval mode.
    # Residual stream carried in bf16 between fused block kernels (halves the
    # per-block activation DMA); all LN/softmax/residual math is f32 in-kernel.
    z = z.astype(jnp.bfloat16)

    for bp in params["blocks"]:
        z = run_block(z, bp, heads)

    return run_head(z[:, 0, :], params["norm_w"], params["norm_b"],
                    params["cls_w"], params["cls_b"], params["n_cls"])


# ----------------- parameter construction ------------------------------------
def init_params(key, *, units, input_dim, patch, channels, mlp_ratio, embed, n_cls):
    num_patches = (input_dim // patch) ** 2
    hidden = int(embed * mlp_ratio)

    def dense(k, fan_in, fan_out):
        return jax.random.normal(k, (fan_in, fan_out), jnp.float32) * 0.02

    keys = list(jax.random.split(key, 2 + 4 * units))
    params = {
        "conv_w": dense(keys[0], channels * patch * patch, embed),
        "conv_b": jnp.zeros((1, embed), jnp.float32),
        "cls_token": jnp.zeros((1, 1, embed), jnp.float32),      # nn.Parameter(zeros)
        "pos_embed": jnp.zeros((1, num_patches + 1, embed), jnp.float32),
        "norm_w": jnp.ones((1, embed), jnp.float32),
        "norm_b": jnp.zeros((1, embed), jnp.float32),
        "cls_w": dense(keys[1], embed, n_cls),
        "cls_b": jnp.zeros((1, n_cls), jnp.float32),
        "blocks": [],
    }
    for u in range(units):
        ks = keys[2 + 4 * u: 2 + 4 * (u + 1)]
        params["blocks"].append({
            "ln1_w": jnp.ones((1, embed), jnp.float32),
            "ln1_b": jnp.zeros((1, embed), jnp.float32),
            "qkv_w": dense(ks[0], embed, 3 * embed),
            "qkv_b": jnp.zeros((1, 3 * embed), jnp.float32),
            "proj_w": dense(ks[1], embed, embed),
            "proj_b": jnp.zeros((1, embed), jnp.float32),
            "ln2_w": jnp.ones((1, embed), jnp.float32),
            "ln2_b": jnp.zeros((1, embed), jnp.float32),
            "fc1_w": dense(ks[2], embed, hidden),
            "fc1_b": jnp.zeros((1, hidden), jnp.float32),
            "fc2_w": dense(ks[3], hidden, embed),
            "fc2_b": jnp.zeros((1, embed), jnp.float32),
        })
    return params


def prepare_params(p, *, heads):
    """Cast matmul weights to bf16 (MXU-native, halves weight DMA), reshape the
    output-projection weight to (heads, hd, E) so the head-concat folds into a
    batched projection, and pad the classifier to a lane-dense 128-column
    output.  Biases / LN params stay f32."""
    E, n_cls = p["cls_w"].shape
    hd = E // heads
    npad = ((n_cls + LANE - 1) // LANE) * LANE
    out = {
        "conv_w": _bf16(p["conv_w"]), "conv_b": p["conv_b"],
        "cls_token": p["cls_token"], "pos_embed": p["pos_embed"],
        "norm_w": p["norm_w"], "norm_b": p["norm_b"],
        "cls_w": _bf16(jnp.pad(p["cls_w"], ((0, 0), (0, npad - n_cls)))),
        "cls_b": jnp.pad(p["cls_b"], ((0, 0), (0, npad - n_cls))),
        "n_cls": n_cls,
        "blocks": [],
    }
    for bp in p["blocks"]:
        out["blocks"].append({
            "ln1_w": bp["ln1_w"], "ln1_b": bp["ln1_b"],
            "qkv_w": _bf16(bp["qkv_w"]), "qkv_b": bp["qkv_b"],
            "proj_w": _bf16(bp["proj_w"]).reshape(heads, hd, E),
            "proj_b": bp["proj_b"],
            "ln2_w": bp["ln2_w"], "ln2_b": bp["ln2_b"],
            "fc1_w": _bf16(bp["fc1_w"]), "fc1_b": bp["fc1_b"],
            "fc2_w": _bf16(bp["fc2_w"]), "fc2_b": bp["fc2_b"],
        })
    return out


if __name__ == "__main__":
    # Small ViT: 2 blocks, 2 heads (hd=64 like ViT-B), 32x32 image, 8x8 patches,
    # embed 128 (lane-dense), MLP hidden 512, 10 classes.
    units, heads, input_dim, patch = 2, 2, 32, 8
    channels, mlp_ratio, embed, n_cls = 3, 4.0, 128, 10

    key = jax.random.PRNGKey(0)
    pkey, xkey = jax.random.split(key)
    raw = init_params(pkey, units=units, input_dim=input_dim, patch=patch,
                      channels=channels, mlp_ratio=mlp_ratio, embed=embed,
                      n_cls=n_cls)
    params = prepare_params(raw, heads=heads)

    x = jax.random.normal(xkey, (2, channels, input_dim, input_dim), jnp.float32)

    out = vit_forward(x, params, heads=heads, patch=patch)
    out = jax.block_until_ready(out)
    assert out.shape == (2, n_cls), out.shape
    print("KERNEL_OK")
</pallas_src>

<mosaic_0001>
module attributes {stable_mosaic.version = 11 : i64} {
  func.func @k(%arg0: i32, %arg1: memref<8x128xf32, #tpu.memory_space<vmem>>, %arg2: memref<8x128xf32, #tpu.memory_space<vmem>>) attributes {dimension_semantics = [#tpu.dimension_semantics<arbitrary>], iteration_bounds = array<i64: 2>, scalar_prefetch = 0 : i64, scratch_operands = 0 : i64, tpu.core_type = #tpu.core_type<tc>, window_params = [{pipeline_mode = #tpu.pipeline_mode<synchronous>, transform_indices = @transform_0, window_bounds = array<i64: 8, 128>}, {pipeline_mode = #tpu.pipeline_mode<synchronous>, transform_indices = @transform_1, window_bounds = array<i64: 8, 128>}]} {
    %c0 = arith.constant 0 : index
    %c0_0 = arith.constant 0 : index
    %0 = vector.load %arg1[%c0, %c0_0] : memref<8x128xf32, #tpu.memory_space<vmem>>, vector<8x128xf32>
    %c0_1 = arith.constant 0 : index
    %c0_2 = arith.constant 0 : index
    %1 = vector.load %arg2[%c0_1, %c0_2] : memref<8x128xf32, #tpu.memory_space<vmem>>, vector<8x128xf32>
    tpu.vector_store %arg2[%c0_1, %c0_2], %0 {strides = array<i32>} : memref<8x128xf32, #tpu.memory_space<vmem>>, vector<8x128xf32>,
    return
  }
  func.func @transform_0(%arg0: i32) -> (i32, i32) {
    %c0_i32 = arith.constant 0 : i32
    %c0_i32_0 = arith.constant 0 : i32
    %c0_i32_1 = arith.constant 0 : i32
    return %c0_i32, %c0_i32_0 : i32, i32
  }
  func.func @transform_1(%arg0: i32) -> (i32, i32) {
    %c0_i32 = arith.constant 0 : i32
    %c0_i32_0 = arith.constant 0 : i32
    %c0_i32_1 = arith.constant 0 : i32
    return %c0_i32, %c0_i32_0 : i32, i32
  }
}

module attributes {stable_mosaic.version = 11 : i64} {
  func.func @patch_embed_kernel(%arg0: i32, %arg1: memref<32x192xbf16, #tpu.memory_space<vmem>>, %arg2: memref<192x128xbf16, #tpu.memory_space<vmem>>, %arg3: memref<1x128xf32, #tpu.memory_space<vmem>>, %arg4: memref<32x128xbf16, #tpu.memory_space<vmem>>) attributes {dimension_semantics = [#tpu.dimension_semantics<parallel>], iteration_bounds = array<i64: 1>, scalar_prefetch = 0 : i64, scratch_operands = 0 : i64, tpu.core_type = #tpu.core_type<tc>, window_params = [{transform_indices = @transform_0, window_bounds = array<i64: 32, 192>}, {pipeline_mode = #tpu.pipeline_mode<synchronous>, transform_indices = @transform_1, window_bounds = array<i64: 192, 128>}, {pipeline_mode = #tpu.pipeline_mode<synchronous>, transform_indices = @transform_2, window_bounds = array<i64: 1, 128>}, {transform_indices = @transform_3, window_bounds = array<i64: 32, 128>}]} {
    %c0 = arith.constant 0 : index
    %c0_0 = arith.constant 0 : index
    %0 = vector.load %arg1[%c0, %c0_0] : memref<32x192xbf16, #tpu.memory_space<vmem>>, vector<32x192xbf16>
    %c0_1 = arith.constant 0 : index
    %c0_2 = arith.constant 0 : index
    %1 = vector.load %arg2[%c0_1, %c0_2] : memref<192x128xbf16, #tpu.memory_space<vmem>>, vector<192x128xbf16>
    %cst = arith.constant dense<0.000000e+00> : vector<32x128xf32>
    %2 = tpu.matmul %0, %1, %cst {dimension_numbers = #tpu.dot_dimension_numbers<[1], [0], [0], [1], [0, 0, 1, 1], [], []>} : vector<32x192xbf16>, vector<192x128xbf16>, vector<32x128xf32> -> vector<32x128xf32>
    %c0_3 = arith.constant 0 : index
    %c0_4 = arith.constant 0 : index
    %3 = vector.load %arg3[%c0_3, %c0_4] : memref<1x128xf32, #tpu.memory_space<vmem>>, vector<1x128xf32>
    %4 = vector.broadcast %3 : vector<1x128xf32> to vector<32x128xf32>
    %5 = arith.addf %2, %4 : vector<32x128xf32>
    %6 = arith.truncf %5 : vector<32x128xf32> to vector<32x128xbf16>
    %c0_5 = arith.constant 0 : index
    %c0_6 = arith.constant 0 : index
    %7 = vector.load %arg4[%c0_5, %c0_6] : memref<32x128xbf16, #tpu.memory_space<vmem>>, vector<32x128xbf16>
    tpu.vector_store %arg4[%c0_5, %c0_6], %6 {strides = array<i32>} : memref<32x128xbf16, #tpu.memory_space<vmem>>, vector<32x128xbf16>,
    return
  }
  func.func @transform_0(%arg0: i32) -> (i32, i32) {
    %c0_i32 = arith.constant 0 : i32
    %c0_i32_0 = arith.constant 0 : i32
    return %arg0, %c0_i32 : i32, i32
  }
  func.func @transform_1(%arg0: i32) -> (i32, i32) {
    %c0_i32 = arith.constant 0 : i32
    %c0_i32_0 = arith.constant 0 : i32
    %c0_i32_1 = arith.constant 0 : i32
    return %c0_i32, %c0_i32_0 : i32, i32
  }
  func.func @transform_2(%arg0: i32) -> (i32, i32) {
    %c0_i32 = arith.constant 0 : i32
    %c0_i32_0 = arith.constant 0 : i32
    %c0_i32_1 = arith.constant 0 : i32
    return %c0_i32, %c0_i32_0 : i32, i32
  }
  func.func @transform_3(%arg0: i32) -> (i32, i32) {
    %c0_i32 = arith.constant 0 : i32
    %c0_i32_0 = arith.constant 0 : i32
    return %arg0, %c0_i32 : i32, i32
  }
}

</mosaic_0001>

<bundles_post_ra>
// kernel: tpu_custom_call.1
= control target key start
LH: loop header
LB: loop body
LE: loop exit
PB: predicated region body
PF: predicated region fallthrough
CT: control target
= control target key end

     0   :  { %6 = vsyncpa [#allocation3], 0  ;;  %s340_s0 = inlined_call_operand.hbm [shape: f32[8,128], index: 0, kind: input, shape index: {}]   ;;  %s341_s1 = inlined_call_operand.hbm [shape: f32[8,128], index: 1, kind: output, shape index: {}]  }
   0x1   :  { %7 = vsyncpa [#allocation4], 0  ;;  %s261_s6 = smov 0  }
   0x2 LB: > { %s144_s7 = sadd.s32 4294967295, %s247_s6   ;;  %p145_p0 = scmp.ge.s32.totalorder %s247_s6, 1  ;;  %s247_s6 = sphi %s261_s6, %s13_s6  }
   0x3   : > { %p60_p1 = scmp.lt.s32.totalorder %s247_s6, 3  ;;  %p275_p3 = scmp.eq.s32.totalorder %s144_s7, 0 }
   0x4   : > { %s249_s10 = smov [#allocation2]   ;;  %s179_s15 = scalar_lea.hbm %s340_s0, 128 }
   0x5   : > { %p269_p2 = pnand %p145_p0, %p60_p1  ;;  %s73_s11 = sshll.u32 %s249_s10, 4  ;;  %s74_s11 = int_to_ptr.vmem [resolvable:$true] %s73_s11 }
   0x6   : > { %s346_s9 = scalar_select %p275_p3, 1, 0 }
   0x7   : > { %s345_s8 = scalar_select %p269_p2, 1, 0 }
   0x8   : > { %p161_p4 = pneg %p269_p2  ;;  %p180_p6 = scmp.ne.s32.totalorder %s340_s0, %s179_s15 }
   0x9   : > { %p186_p10 = scmp.lt.u32.totalorder %s179_s15, %s340_s0 }
   0xa   : > { %p283_p5 = pnand %p275_p3, %p161_p4 }
   0xc   : > { %p181_p7 = pneg %p283_p5 }
   0xe   : > { %p182_p8 = pnand %p181_p7, %p180_p6 }
  0x10   : > { %p183_p9 = pneg %p182_p8 }
  0x12   : > { %p188_p11 = pnand %p186_p10, %p183_p9 }
  0x14   : > { %191 = shalt.err (!%p188_p11)
}
  0x15   : > { %s192_s20 = scalar_lea.vmem %s74_s11, 128  ;;  %p200_p1 = scmp.lt.s32.totalorder %s74_s11, %s74_s11 }
  0x16   : > { %p193_p12 = scmp.ne.s32.totalorder %s74_s11, %s192_s20  ;;  %p201_p4 = scmp.lt.s32.totalorder %s192_s20, %s192_s20 }
  0x18   : > { %p195_p13 = pnand %p193_p12, %p181_p7  ;;  %p202_p3 = por %p201_p4, %p200_p1 }
  0x1a   : > { %p196_p0 = pneg %p195_p13 }
  0x1c   : > { %p203_p2 = pnand %p202_p3, %p196_p0 }
  0x1e   : > { %206 = shalt.err (!%p203_p2)
}
  0x1f   : > { %164 = dma.hbm_to_vmem [thread:$0]  (!%p283_p5), %s340_s0, 128, %s74_s11, [#allocation3]  }
  0x20   : > { %p348_p6 = scmp.ne.s32.totalorder %s345_s8, 0 }
  0x21   : > { %p349_p8 = scmp.ne.s32.totalorder (!%p348_p6), %s346_s9, 0 }
  0x22   : > { %86 = sbr.rel (%p348_p6) target bundleno = 67 (0x43), region = 24 }
  0x29   : > { %238 = dma.done.wait (%p349_p8), [#allocation3], 128  }
  0x2a   : > { %240 = vsyncadd (%p349_p8), [#allocation3], 4294967168  ;;  %s250_s23 = smov [#allocation5]   ;;  %p311_p2 = scmp.eq.s32.totalorder %s144_s7, 1  ;;  %v96_v0 = vld [vmem:[#allocation2] sm:$0xff] }
  0x2b   : > { %s105_s24 = sshll.u32 %s250_s23, 4  ;;  %97 = vst [vmem:[#allocation5] sm:$0xff] %v96_v0  ;;  %s106_s24 = int_to_ptr.vmem [resolvable:$true] %s105_s24 }
  0x2c   : > { %s207_s26 = scalar_lea.vmem %s106_s24, 128  ;;  %p214_p9 = scmp.lt.s32.totalorder %s106_s24, %s106_s24 }
  0x2d   : > { %p208_p3 = scmp.ne.s32.totalorder %s106_s24, %s207_s26  ;;  %p215_p10 = scmp.lt.s32.totalorder %s207_s26, %s207_s26 }
  0x2f   : > { %p209_p5 = pnand %p208_p3, %p311_p2  ;;  %p216_p11 = por %p215_p10, %p214_p9 }
  0x31   : > { %p210_p7 = pneg %p209_p5 }
  0x33   : > { %p217_p12 = pnand %p216_p11, %p210_p7 }
  0x35   : > { %220 = shalt.err (!%p217_p12)
}
  0x36   : > { %s221_s29 = scalar_lea.hbm %s341_s1, 128 }
  0x37   : > { %p222_p13 = scmp.ne.s32.totalorder %s341_s1, %s221_s29  ;;  %p227_p4 = scmp.lt.u32.totalorder %s221_s29, %s341_s1 }
  0x39   : > { %p223_p0 = pnand %p222_p13, %p311_p2 }
  0x3b   : > { %p224_p1 = pneg %p223_p0 }
  0x3d   : > { %p229_p6 = pnand %p227_p4, %p224_p1 }
  0x3f   : > { %232 = shalt.err (!%p229_p6)
}
  0x40   : > { %158 = dma.vmem_to_hbm [thread:$0]  (%p311_p2), %s106_s24, 128, %s341_s1, [#allocation4]  }
  0x41   : > { %242 = dma.done.wait (%p311_p2), [#allocation4], 128  }
  0x42   : > { %244 = vsyncadd (%p311_p2), [#allocation4], 4294967168 }
  0x43 PF: > { %s13_s6 = sadd.s32 1, %s247_s6  }
  0x44   : > { %p10_p8 = scmp.ge.s32.totalorder %s13_s6, 4  }
  0x46   :  { %12 = sbr.rel (!%p10_p8) target bundleno = 2 (0x2), region = 53 }
  0x4d   :  { %118 = vsyncpa [#allocation3], 1 }
  0x4e   :  { %120 = vsyncpa [#allocation3 + $0x1], 1 }
  0x4f   :  { %121 = vsyncpa [#allocation4], 1 }
  0x50   :  { %123 = vsyncpa [#allocation4 + $0x1], 1 }

// kernel: tpu_custom_call.1
= control target key start
LH: loop header
LB: loop body
LE: loop exit
PB: predicated region body
PF: predicated region fallthrough
CT: control target
= control target key end

     0   :  { %8 = vsyncpa [#allocation3], 0  ;;  %s496_s0 = inlined_call_operand.hbm [shape: bf16[32,192], index: 0, kind: input, shape index: {}]   ;;  %s497_s1 = inlined_call_operand.hbm [shape: bf16[192,128], index: 1, kind: input, shape index: {}]   ;;  %s498_s2 = inlined_call_operand.vmem [shape: f32[1,128], index: 2, kind: input, shape index: {}]   ;;  %s499_s3 = inlined_call_operand.hbm [shape: bf16[32,128], index: 3, kind: output, shape index: {}]  }
   0x1   :  { %9 = vsyncpa [#allocation6], 0 }
   0x2   :  { %10 = vsyncpa [#allocation4], 0  ;;  %s423_s12 = smov [#allocation2]   ;;  %s351_s16 = scalar_lea.hbm %s496_s0, 512 }
   0x3   :  { %s16_s13 = sshll.u32 %s423_s12, 4  ;;  %p352_p0 = scmp.ne.s32.totalorder %s496_s0, %s351_s16  ;;  %s17_s13 = int_to_ptr.vmem [resolvable:$true] %s16_s13 }
   0x4   :  { %p355_p1 = scmp.lt.u32.totalorder %s351_s16, %s496_s0 }
   0x6   :  { %p357_p2 = pnand %p355_p1, %p352_p0 }
   0x8   :  { %360 = shalt.err (!%p357_p2)
}
   0x9   :  { %s361_s21 = scalar_lea.vmem %s17_s13, 512  ;;  %p366_p4 = scmp.lt.s32.totalorder %s17_s13, %s17_s13 }
   0xa   :  { %p362_p3 = scmp.ne.s32.totalorder %s17_s13, %s361_s21  ;;  %p367_p5 = scmp.lt.s32.totalorder %s361_s21, %s361_s21 }
   0xc   :  { %p368_p6 = por %p367_p5, %p366_p4 }
   0xe   :  { %p369_p7 = pnand %p368_p6, %p362_p3 }
  0x10   :  { %372 = shalt.err (!%p369_p7)
}
  0x11   :  { %s424_s22 = smov 128   ;;  %s425_s23 = smov 8  }
  0x12   :  { %22 = dma.hbm_to_vmem [thread:$0]  %s496_s0, 512, %s17_s13, [#allocation3], %s424_s22, %s424_s22, %s425_s23  }
  0x13   :  { %s426_s26 = smov [#allocation5]   ;;  %s373_s30 = scalar_lea.hbm %s497_s1, 1536 }
  0x14   :  { %s28_s27 = sshll.u32 %s426_s26, 4  ;;  %p374_p8 = scmp.ne.s32.totalorder %s497_s1, %s373_s30  ;;  %s29_s27 = int_to_ptr.vmem [resolvable:$true] %s28_s27 }
  0x15   :  { %p377_p9 = scmp.lt.u32.totalorder %s373_s30, %s497_s1 }
  0x17   :  { %p379_p10 = pnand %p377_p9, %p374_p8 }
  0x19   :  { %382 = shalt.err (!%p379_p10)
}
  0x1a   :  { %s383_s8 = scalar_lea.vmem %s29_s27, 1536  ;;  %p388_p12 = scmp.lt.s32.totalorder %s29_s27, %s29_s27 }
  0x1b   :  { %p384_p11 = scmp.ne.s32.totalorder %s29_s27, %s383_s8  ;;  %p389_p13 = scmp.lt.s32.totalorder %s383_s8, %s383_s8 }
  0x1d   :  { %p390_p0 = por %p389_p13, %p388_p12 }
  0x1f   :  { %p391_p1 = pnand %p390_p0, %p384_p11 }
  0x21   :  { %394 = shalt.err (!%p391_p1)
}
  0x22   :  { %s427_s0 = smov 64   ;;  %s428_s9 = smov 4  }
  0x23   :  { %34 = dma.hbm_to_vmem [thread:$0]  %s497_s1, 1536, %s29_s27, [#allocation6], %s427_s0, %s427_s0, %s428_s9  }
  0x24   :  { %417 = dma.done.wait [#allocation3], 512  }
  0x25   :  { %418 = vsyncadd [#allocation3], 4294966784 }
  0x26   :  { %419 = dma.done.wait [#allocation6], 1536  }
  0x27   :  { %420 = vsyncadd [#allocation6], 4294965760  ;;  %v429_v0 = vmov 0   ;;  %v333_v1 = vld [vmem:[#allocation5] sm:$0xff]   ;;  %v334_v2 = vld [vmem:[#allocation5 + $0x8] sm:$0xff]   ;;  %vm169_vm0 = vcmask 523264  }
  0x28   :  { %176 = vmatprep.subr.bf16.mxu0 %v429_v0  ;;  %301 = vmatprep.subr.bf16.mxu1 %v429_v0  ;;  %v335_v3 = vld [vmem:[#allocation5 + $0x10] sm:$0xff]   ;;  %v336_v4 = vld [vmem:[#allocation5 + $0x18] sm:$0xff]   ;;  %v347_v5 = vld [vmem:[#allocation2 + $0x4] ss:$8 sps:$4 sm:$0xff]   ;;  %s430_s13 = smov [#allocation7]  }
  0x29   :  { %177 = vmatpush1.bf16.msra.mxu0 %v333_v1  ;;  %313 = vmatpush1.bf16.msra.mxu1 %v333_v1  ;;  %v337_v6 = vld [vmem:[#allocation5 + $0x20] sm:$0xff]   ;;  %v350_v7 = vld [vmem:[#allocation2 + $0x14] ss:$8 sps:$4 sm:$0xff]   ;;  %v338_v8 = vld [vmem:[#allocation5 + $0x28] sm:$0xff]   ;;  %s250_s14 = sshll.u32 %s430_s13, 4  ;;  %s251_s14 = int_to_ptr.vmem [resolvable:$true] %s250_s14 }
  0x2a   :  { %178 = vmatprep.subr.bf16.mxu0 %v429_v0  ;;  %302 = vmatprep.subr.bf16.mxu1 %v429_v0  ;;  %v339_v9 = vld [vmem:[#allocation5 + $0x30] sm:$0xff]   ;;  %v340_v10 = vld [vmem:[#allocation5 + $0x38] sm:$0xff]   ;;  %v341_v11 = vld [vmem:[#allocation5 + $0x40] sm:$0xff]   ;;  %p400_p3 = scmp.lt.s32.totalorder %s251_s14, %s251_s14 }
  0x2b   :  { %280 = vmatprep.mubr.msk.bf16.mxu0 %vm169_vm0, %v347_v5  ;;  %281 = vmatprep.mubr.msk.bf16.mxu1 %vm169_vm0, %v350_v7  ;;  %v342_v12 = vld [vmem:[#allocation5 + $0x48] sm:$0xff]   ;;  %v343_v13 = vld [vmem:[#allocation5 + $0x50] sm:$0xff]   ;;  %v344_v14 = vld [vmem:[#allocation5 + $0x58] sm:$0xff]  }
  0x2c   :  { %v345_v15 = vld [vmem:[#allocation2] ss:$8 sps:$4 sm:$0xff]   ;;  %v348_v16 = vld [vmem:[#allocation2 + $0x10] ss:$8 sps:$4 sm:$0xff]  }
  0x2d   :  { %179 = vmatpush1.bf16.msra.mxu0 %v334_v2  ;;  %314 = vmatpush1.bf16.msra.mxu1 %v334_v2  ;;  %v263_v17 = vld [vmem:[%s498_s2] ss:$0 sm:$0xff]  ;;  %s395_s2 = scalar_lea.vmem %s251_s14, 256 }
  0x2e   :  { %180 = vmatprep.subr.bf16.mxu0 %v429_v0  ;;  %303 = vmatprep.subr.bf16.mxu1 %v429_v0  ;;  %p396_p2 = scmp.ne.s32.totalorder %s251_s14, %s395_s2  ;;  %p401_p4 = scmp.lt.s32.totalorder %s395_s2, %s395_s2 }
  0x30   :  { %p402_p5 = por %p401_p4, %p400_p3 }
  0x31   :  { %181 = vmatpush1.bf16.msra.mxu0 %v335_v3  ;;  %315 = vmatpush1.bf16.msra.mxu1 %v335_v3 }
  0x32   :  { %182 = vmatprep.subr.bf16.mxu0 %v429_v0  ;;  %304 = vmatprep.subr.bf16.mxu1 %v429_v0  ;;  %p403_p6 = pnand %p402_p5, %p396_p2 }
  0x35   :  { %183 = vmatpush1.bf16.msra.mxu0 %v336_v4  ;;  %316 = vmatpush1.bf16.msra.mxu1 %v336_v4 }
  0x36   :  { %184 = vmatprep.subr.bf16.mxu0 %v429_v0  ;;  %305 = vmatprep.subr.bf16.mxu1 %v429_v0 }
  0x39   :  { %185 = vmatpush1.bf16.msra.mxu0 %v337_v6  ;;  %317 = vmatpush1.bf16.msra.mxu1 %v337_v6 }
  0x3a   :  { %186 = vmatprep.subr.bf16.mxu0 %v429_v0  ;;  %306 = vmatprep.subr.bf16.mxu1 %v429_v0 }
  0x3d   :  { %187 = vmatpush1.bf16.msra.mxu0 %v338_v8  ;;  %318 = vmatpush1.bf16.msra.mxu1 %v338_v8 }
  0x3e   :  { %188 = vmatprep.subr.bf16.mxu0 %v429_v0  ;;  %307 = vmatprep.subr.bf16.mxu1 %v429_v0 }
  0x41   :  { %189 = vmatpush1.bf16.msra.mxu0 %v339_v9  ;;  %319 = vmatpush1.bf16.msra.mxu1 %v339_v9 }
  0x42   :  { %190 = vmatprep.subr.bf16.mxu0 %v429_v0  ;;  %308 = vmatprep.subr.bf16.mxu1 %v429_v0 }
  0x45   :  { %191 = vmatpush1.bf16.msra.mxu0 %v340_v10  ;;  %320 = vmatpush1.bf16.msra.mxu1 %v340_v10 }
  0x46   :  { %192 = vmatprep.subr.bf16.mxu0 %v429_v0  ;;  %309 = vmatprep.subr.bf16.mxu1 %v429_v0 }
  0x49   :  { %193 = vmatpush1.bf16.msra.mxu0 %v341_v11  ;;  %321 = vmatpush1.bf16.msra.mxu1 %v341_v11 }
  0x4a   :  { %194 = vmatprep.subr.bf16.mxu0 %v429_v0  ;;  %310 = vmatprep.subr.bf16.mxu1 %v429_v0 }
  0x4d   :  { %195 = vmatpush1.bf16.msra.mxu0 %v342_v12  ;;  %322 = vmatpush1.bf16.msra.mxu1 %v342_v12 }
  0x4e   :  { %196 = vmatprep.subr.bf16.mxu0 %v429_v0  ;;  %311 = vmatprep.subr.bf16.mxu1 %v429_v0 }
  0x51   :  { %197 = vmatpush1.bf16.msra.mxu0 %v343_v13  ;;  %323 = vmatpush1.bf16.msra.mxu1 %v343_v13 }
  0x52   :  { %198 = vmatprep.subr.bf16.mxu0 %v429_v0  ;;  %312 = vmatprep.subr.bf16.mxu1 %v429_v0 }
  0x55   :  { %199 = vmatpush1.bf16.msra.mxu0 %v344_v14  ;;  %324 = vmatpush1.bf16.msra.mxu1 %v344_v14 }
  0x58   :  { %209 = vmatmul.mubr.bf16.vlgmr.msra.gmra.mrb[0].mxu0 %v345_v15  ;;  %217 = vmatmul.mubr.bf16.vlgmr.msra.gmra.mrb[0].mxu1 %v348_v16 }
 0x12b   :  { %v210_v18 = vpop.f32.mrb[0].mxu0  ;;  %v218_v19 = vpop.f32.mrb[0].mxu1 }
 0x12c   :  { %v212_v20 = vpop.f32.mrb[1].mxu0  ;;  %v220_v21 = vpop.f32.mrb[1].mxu1  ;;  %v211_v24 = vadd.f32 %v263_v17, %v210_v18  ;;  %v219_v25 = vadd.f32 %v263_v17, %v218_v19 }
 0x12d   :  { %v213_v22 = vpop.f32.mrb[2].mxu0  ;;  %v221_v23 = vpop.f32.mrb[2].mxu1 }
 0x12e   :  { %v214_v26 = vadd.f32 %v263_v17, %v213_v22  ;;  %v222_v27 = vadd.f32 %v263_v17, %v221_v23  ;;  %v215_v28 = vpop.f32.mrb[3].mxu0  ;;  %v223_v29 = vpop.f32.mrb[3].mxu1 }
 0x130   :  { %v293_v30 = vpack.c.bf16 %v214_v26, %v211_v24  ;;  %v298_v31 = vpack.c.bf16 %v222_v27, %v219_v25 }
 0x132   :  { %294 = vst [vmem:[#allocation7] sm:$0xff] %v293_v30   ;;  %300 = vst [vmem:[#allocation7 + $0x8] sm:$0xff] %v298_v31  }
 0x133   :  { %406 = shalt.err (!%p403_p6)
}
 0x134   :  { %s407_s17 = scalar_lea.hbm %s499_s3, 256 }
 0x135   :  { %p408_p7 = scmp.ne.s32.totalorder %s499_s3, %s407_s17  ;;  %p411_p8 = scmp.lt.u32.totalorder %s407_s17, %s499_s3 }
 0x137   :  { %p413_p9 = pnand %p411_p8, %p408_p7 }
 0x139   :  { %416 = shalt.err (!%p413_p9)
}
 0x13a   :  { %256 = dma.vmem_to_hbm [thread:$0]  %s251_s14, 256, %s499_s3, [#allocation4], %s427_s0, %s427_s0, %s428_s9  }
 0x13b   :  { %421 = dma.done.wait [#allocation4], 256  }
 0x13c   :  { %422 = vsyncadd [#allocation4], 4294967040 }
 0x13d   :  { %260 = vsyncpa [#allocation3], 1 }
 0x13e   :  { %261 = vsyncpa [#allocation6], 1 }
 0x13f   :  { %262 = vsyncpa [#allocation4], 1 }

</bundles_post_ra>
